<compile_context>
chip_gen: v7x
topology: tpu7x:2x2x1
jax: 0.10.0
libtpu: 0.0.40
codegen_flags: <defaults>
</compile_context>

<pallas_src>
import math

import jax
import jax.numpy as jnp
from jax.experimental import pallas as pl
from jax.experimental.pallas import tpu as pltpu


def _concat_copy_kernel(off_ref, x_ref, o_ref):
    # off_ref: SMEM scalar-prefetch (frame-block offset of this group);
    #          consumed by the index_maps only.
    # x_ref / o_ref: (f_tile, S, D) VMEM tiles — pure block copy.
    del off_ref
    o_ref[...] = x_ref[...]


def _pick_frame_tile(n_group_frames, frame_start, frame_bytes, target_bytes):
    """Largest #frames per block that (a) divides the group size, (b) keeps the
    group's start frame block-aligned (start % tile == 0), and (c) fits the
    per-block VMEM budget."""
    align = math.gcd(n_group_frames, frame_start)  # gcd(n, 0) == n
    max_f = max(1, target_bytes // max(1, frame_bytes))
    best = 1
    for t in range(1, align + 1):
        if align % t == 0 and t <= max_f:
            best = t
    return best


def _group_copy(image_embeds, frame_start, n_group_frames, *, target_block_bytes):
    """Copy frames [frame_start, frame_start + n_group_frames) into a fresh
    (n_group_frames * S, D) array via a single pipelined Pallas copy."""
    _, S, D = image_embeds.shape
    dtype = image_embeds.dtype
    frame_bytes = S * D * jnp.dtype(dtype).itemsize

    f_tile = _pick_frame_tile(n_group_frames, frame_start, frame_bytes,
                              target_block_bytes)
    n_tiles = n_group_frames // f_tile

    # Frame-block offset of this group, via scalar prefetch, so all full
    # groups share one compiled kernel regardless of where they start.
    off = jnp.array([frame_start // f_tile], dtype=jnp.int32)

    packed = pl.pallas_call(
        _concat_copy_kernel,
        out_shape=jax.ShapeDtypeStruct((n_group_frames, S, D), dtype),
        grid_spec=pltpu.PrefetchScalarGridSpec(
            num_scalar_prefetch=1,
            grid=(n_tiles,),
            in_specs=[
                pl.BlockSpec((f_tile, S, D),
                             lambda i, off_ref: (off_ref[0] + i, 0, 0)),
            ],
            out_specs=pl.BlockSpec((f_tile, S, D),
                                   lambda i, off_ref: (i, 0, 0)),
        ),
        compiler_params=pltpu.CompilerParams(
            dimension_semantics=("parallel",),
            # Plenty of headroom: in + out blocks, double-buffered, at
            # <= target_block_bytes each stays far below this on all chips.
            vmem_limit_bytes=32 * 1024 * 1024,
        ),
    )(off, image_embeds)

    # Metadata-only collapse of the leading (frames, seq) axes; no extra copy.
    return packed.reshape(n_group_frames * S, D)


def concat_adapter_forward(image_embeds: jax.Array, n_frames: int,
                           *, target_block_bytes: int = 2 * 1024 * 1024):
    """Pallas implementation of ConcatAdapter.forward.

    image_embeds: (total_frames, S, D) array.
    Returns a list of (group_frames * S, D) arrays, one per chunk of
    `n_frames` frames (last chunk may be smaller, matching torch.split).
    """
    total_frames = image_embeds.shape[0]
    ret = []
    for start in range(0, total_frames, n_frames):
        group_frames = min(n_frames, total_frames - start)
        ret.append(
            _group_copy(image_embeds, start, group_frames,
                        target_block_bytes=target_block_bytes)
        )
    return ret


def _reference(image_embeds, n_frames):
    total_frames, _, D = image_embeds.shape
    return [
        image_embeds[s:s + n_frames].reshape(-1, D)
        for s in range(0, total_frames, n_frames)
    ]


def _check(x, n_frames):
    out = [jax.block_until_ready(o) for o in concat_adapter_forward(x, n_frames)]
    ref = _reference(x, n_frames)
    assert len(out) == len(ref), (len(out), len(ref))
    for o, r in zip(out, ref):
        assert o.shape == r.shape, (o.shape, r.shape)
        assert jnp.array_equal(o, r), "mismatch vs reference"


if __name__ == "__main__":
    key = jax.random.PRNGKey(0)

    # Small shapes consistent with the module: 8 frames, seq=8 tokens/frame,
    # feature=128 (stand-in for num_features=1408), n_frames=4 -> 2 groups.
    total_frames, S, D = 8, 8, 128
    n_frames = 4
    x = jax.random.normal(key, (total_frames, S, D), dtype=jnp.float32)
    _check(x, n_frames)

    # Ragged final group (torch.split allows a smaller last chunk) + bf16.
    x2 = jax.random.normal(jax.random.PRNGKey(0), (6, S, D), dtype=jnp.bfloat16)
    _check(x2, n_frames)

    # Single group: n_frames >= total_frames (whole input flattened at once).
    x3 = jax.random.normal(jax.random.PRNGKey(0), (3, S, D), dtype=jnp.float32)
    _check(x3, 16)

    print("KERNEL_OK")
</pallas_src>

<mosaic_0001>
module attributes {stable_mosaic.version = 11 : i64} {
  func.func @_concat_copy_kernel(%arg0: i32, %arg1: memref<1xi32, #tpu.memory_space<smem>>, %arg2: memref<4x8x128xf32, #tpu.memory_space<vmem>>, %arg3: memref<4x8x128xf32, #tpu.memory_space<vmem>>) attributes {dimension_semantics = [#tpu.dimension_semantics<parallel>], iteration_bounds = array<i64: 1>, scalar_prefetch = 1 : i64, scratch_operands = 0 : i64, tpu.core_type = #tpu.core_type<tc>, window_params = [{transform_indices = @transform_0, window_bounds = array<i64: 4, 8, 128>}, {transform_indices = @transform_1, window_bounds = array<i64: 4, 8, 128>}]} {
    %c0 = arith.constant 0 : index
    %c0_0 = arith.constant 0 : index
    %c0_1 = arith.constant 0 : index
    %0 = vector.load %arg2[%c0, %c0_0, %c0_1] : memref<4x8x128xf32, #tpu.memory_space<vmem>>, vector<4x8x128xf32>
    %c0_2 = arith.constant 0 : index
    %c0_3 = arith.constant 0 : index
    %c0_4 = arith.constant 0 : index
    %1 = vector.load %arg3[%c0_2, %c0_3, %c0_4] : memref<4x8x128xf32, #tpu.memory_space<vmem>>, vector<4x8x128xf32>
    tpu.vector_store %arg3[%c0_2, %c0_3, %c0_4], %0 {strides = array<i32>} : memref<4x8x128xf32, #tpu.memory_space<vmem>>, vector<4x8x128xf32>,
    return
  }
  func.func @transform_0(%arg0: i32, %arg1: memref<1xi32, #tpu.memory_space<smem>>) -> (i32, i32, i32) {
    %c0 = arith.constant 0 : index
    %0 = memref.load %arg1[%c0] : memref<1xi32, #tpu.memory_space<smem>>
    %1 = arith.addi %0, %arg0 : i32
    %c0_i32 = arith.constant 0 : i32
    %c0_i32_0 = arith.constant 0 : i32
    %c0_i32_1 = arith.constant 0 : i32
    return %1, %c0_i32, %c0_i32_0 : i32, i32, i32
  }
  func.func @transform_1(%arg0: i32, %arg1: memref<1xi32, #tpu.memory_space<smem>>) -> (i32, i32, i32) {
    %c0_i32 = arith.constant 0 : i32
    %c0_i32_0 = arith.constant 0 : i32
    %c0_i32_1 = arith.constant 0 : i32
    return %arg0, %c0_i32, %c0_i32_0 : i32, i32, i32
  }
}

</mosaic_0001>

<bundles_post_ra>
// kernel: tpu_custom_call.1
= control target key start
LH: loop header
LB: loop body
LE: loop exit
PB: predicated region body
PF: predicated region fallthrough
CT: control target
= control target key end

     0   :  { %8 = vsyncpa [#allocation5], 0  ;;  %s166_s0 = inlined_call_operand.<no memory space> [shape: s32[1], index: 0, kind: input, shape index: {}]   ;;  %s167_s1 = inlined_call_operand.hbm [shape: f32[8,8,128], index: 1, kind: input, shape index: {}]   ;;  %s168_s2 = inlined_call_operand.hbm [shape: f32[4,8,128], index: 2, kind: output, shape index: {}]  }
   0x1   :  { %9 = vsyncpa [#allocation6], 0  ;;  %s62_s11 = sshll.u32 %s166_s0, 9  ;;  %s117_s15 = smov [#allocation4]  }
   0x2   :  { %s19_s14 = scalar_lea.hbm %s167_s1, %s62_s11  ;;  %s20_s16 = sshll.u32 %s117_s15, 4  ;;  %s21_s16 = int_to_ptr.vmem [resolvable:$true] %s20_s16 }
   0x3   :  { %s67_s17 = scalar_lea.hbm %s19_s14, 512  ;;  %s69_s20 = scalar_lea.hbm %s167_s1, 1024 }
   0x4   :  { %p68_p0 = scmp.ne.s32.totalorder %s19_s14, %s67_s17  ;;  %p70_p1 = scmp.lt.u32.totalorder %s19_s14, %s167_s1 }
   0x5   :  { %p71_p2 = scmp.lt.u32.totalorder %s69_s20, %s67_s17  ;;  %p73_p4 = scmp.lt.u32.totalorder %s67_s17, %s19_s14 }
   0x7   :  { %p72_p3 = por %p71_p2, %p70_p1 }
   0x9   :  { %p74_p5 = por %p73_p4, %p72_p3 }
   0xb   :  { %p75_p6 = pnand %p74_p5, %p68_p0 }
   0xd   :  { %78 = shalt.err (!%p75_p6)
}
   0xe   :  { %s79_s0 = scalar_lea.vmem %s21_s16, 512  ;;  %p84_p8 = scmp.lt.s32.totalorder %s21_s16, %s21_s16 }
   0xf   :  { %p80_p7 = scmp.ne.s32.totalorder %s21_s16, %s79_s0  ;;  %p85_p9 = scmp.lt.s32.totalorder %s79_s0, %s79_s0 }
  0x11   :  { %p86_p10 = por %p85_p9, %p84_p8 }
  0x13   :  { %p87_p11 = pnand %p86_p10, %p80_p7 }
  0x15   :  { %90 = shalt.err (!%p87_p11)
}
  0x16   :  { %s118_s23 = smov 128   ;;  %s119_s24 = smov 8  }
  0x17   :  { %26 = dma.hbm_to_vmem [thread:$0]  %s19_s14, 512, %s21_s16, [#allocation5], %s118_s23, %s118_s23, %s119_s24  }
  0x18   :  { %113 = dma.done.wait [#allocation5], 512  }
  0x19   :  { %114 = vsyncadd [#allocation5], 4294966784  ;;  %s120_s1 = smov [#allocation7]   ;;  %v33_v0 = vld [vmem:[#allocation4] sm:$0xff]  ;;  %v34_v1 = vld [vmem:[#allocation4 + $0x8] sm:$0xff] }
  0x1a   :  { %s46_s25 = sshll.u32 %s120_s1, 4  ;;  %v35_v2 = vld [vmem:[#allocation4 + $0x10] sm:$0xff]  ;;  %37 = vst [vmem:[#allocation7] sm:$0xff] %v33_v0  ;;  %38 = vst [vmem:[#allocation7 + $0x8] sm:$0xff] %v34_v1  ;;  %v36_v3 = vld [vmem:[#allocation4 + $0x18] sm:$0xff]  ;;  %s47_s25 = int_to_ptr.vmem [resolvable:$true] %s46_s25 }
  0x1b   :  { %39 = vst [vmem:[#allocation7 + $0x10] sm:$0xff] %v35_v2  ;;  %40 = vst [vmem:[#allocation7 + $0x18] sm:$0xff] %v36_v3  ;;  %s91_s26 = scalar_lea.vmem %s47_s25, 512  ;;  %p96_p13 = scmp.lt.s32.totalorder %s47_s25, %s47_s25 }
  0x1c   :  { %p92_p12 = scmp.ne.s32.totalorder %s47_s25, %s91_s26  ;;  %p97_p0 = scmp.lt.s32.totalorder %s91_s26, %s91_s26 }
  0x1e   :  { %p98_p1 = por %p97_p0, %p96_p13 }
  0x20   :  { %p99_p2 = pnand %p98_p1, %p92_p12 }
  0x22   :  { %102 = shalt.err (!%p99_p2)
}
  0x23   :  { %s103_s29 = scalar_lea.hbm %s168_s2, 512 }
  0x24   :  { %p104_p3 = scmp.ne.s32.totalorder %s168_s2, %s103_s29  ;;  %p107_p4 = scmp.lt.u32.totalorder %s103_s29, %s168_s2 }
  0x26   :  { %p109_p5 = pnand %p107_p4, %p104_p3 }
  0x28   :  { %112 = shalt.err (!%p109_p5)
}
  0x29   :  { %52 = dma.vmem_to_hbm [thread:$0]  %s47_s25, 512, %s168_s2, [#allocation6], %s118_s23, %s118_s23, %s119_s24  }
  0x2a   :  { %115 = dma.done.wait [#allocation6], 512  }
  0x2b   :  { %116 = vsyncadd [#allocation6], 4294966784 }
  0x2c   :  { %56 = vsyncpa [#allocation5], 1 }
  0x2d   :  { %57 = vsyncpa [#allocation6], 1 }

</bundles_post_ra>
